<compile_context>
chip_gen: v7x
topology: tpu7x:2x2x1
jax: 0.10.0
libtpu: 0.0.40
codegen_flags: <defaults>
</compile_context>

<pallas_src>
import math
import functools

import jax
import jax.numpy as jnp
from jax import lax
from jax.experimental import pallas as pl
from jax.experimental.pallas import tpu as pltpu


# ---------------------------------------------------------------------------
# helpers
# ---------------------------------------------------------------------------
def _pick_tile(dim, max_tile, gran):
    """Largest tile <= max_tile that divides `dim` and is a multiple of `gran`.

    Falls back to the full dim (always a legal BlockSpec block size)."""
    if dim <= max_tile:
        return dim
    t = (max_tile // gran) * gran
    while t >= gran:
        if dim % t == 0:
            return t
        t -= gran
    return dim


# ---------------------------------------------------------------------------
# Kernel 1: tiled dense projection  y = x @ W + b
#   grid = (M/tm, N/tn, K/tk), f32 accumulator in VMEM, K axis last ("arbitrary")
# ---------------------------------------------------------------------------
def _linear_kernel(x_ref, w_ref, b_ref, o_ref, acc_ref):
    @pl.when(pl.program_id(2) == 0)
    def _():
        acc_ref[...] = jnp.zeros_like(acc_ref)

    # bf16 operands for the MXU, f32 accumulation.
    acc_ref[...] += jnp.dot(
        x_ref[...].astype(jnp.bfloat16),
        w_ref[...].astype(jnp.bfloat16),
        preferred_element_type=jnp.float32)

    @pl.when(pl.program_id(2) == pl.num_programs(2) - 1)
    def _():
        o_ref[...] = (acc_ref[...] + b_ref[...]).astype(o_ref.dtype)


def pallas_linear(x, w, b, out_dtype=None, tm=512, tn=256, tk=512):
    """x: (M, K), w: (K, N), b: (N,) -> (M, N) in `out_dtype`."""
    M, K = x.shape
    Kw, N = w.shape
    assert K == Kw
    out_dtype = x.dtype if out_dtype is None else out_dtype

    tm = _pick_tile(M, tm, 8)
    tn = _pick_tile(N, tn, 128)
    tk = _pick_tile(K, tk, 128)
    grid = (M // tm, N // tn, K // tk)

    b2 = b.reshape(1, N).astype(jnp.float32)

    cost = pl.CostEstimate(
        flops=2 * M * N * K,
        transcendentals=0,
        bytes_accessed=(M * K * x.dtype.itemsize + K * N * w.dtype.itemsize
                        + M * N * jnp.dtype(out_dtype).itemsize + N * 4))

    return pl.pallas_call(
        _linear_kernel,
        out_shape=jax.ShapeDtypeStruct((M, N), out_dtype),
        grid_spec=pltpu.PrefetchScalarGridSpec(
            num_scalar_prefetch=0,
            grid=grid,
            in_specs=[
                pl.BlockSpec((tm, tk), lambda i, j, k: (i, k)),
                pl.BlockSpec((tk, tn), lambda i, j, k: (k, j)),
                pl.BlockSpec((1, tn), lambda i, j, k: (0, j)),
            ],
            out_specs=pl.BlockSpec((tm, tn), lambda i, j, k: (i, j)),
            scratch_shapes=[pltpu.VMEM((tm, tn), jnp.float32)],
        ),
        compiler_params=pltpu.CompilerParams(
            dimension_semantics=("parallel", "parallel", "arbitrary"),
            vmem_limit_bytes=48 * 1024 * 1024),
        cost_estimate=cost,
    )(x, w, b2)


# ---------------------------------------------------------------------------
# Kernel 2: flash-style attention over a packed QKV activation
#   qkv: (B, S, 3*D) with columns [Q | K | V]; within each D chunk, head h owns
#   columns [h*d_k, (h+1)*d_k)  (exactly torch's .view(B, S, h, d_k) layout).
#   grid = (B, S/tq, S/tkv); all heads of a (batch, q-block) handled per step so
#   the HBM input/output blocks are lane-dense (last dim = D).
# ---------------------------------------------------------------------------
def _flash_attention_kernel(q_ref, k_ref, v_ref, o_ref, m_ref, l_ref, acc_ref,
                            *, n_heads, d_k, scale):
    ki = pl.program_id(2)

    @pl.when(ki == 0)
    def _():
        m_ref[...] = jnp.full_like(m_ref, -jnp.inf)
        l_ref[...] = jnp.zeros_like(l_ref)
        acc_ref[...] = jnp.zeros_like(acc_ref)

    # Fold the 1/sqrt(d_k) scale into q once; bf16 MXU operands, f32 statistics.
    q = (q_ref[0].astype(jnp.float32) * scale).astype(jnp.bfloat16)   # (tq,  D)
    k = k_ref[0].astype(jnp.bfloat16)                                 # (tkv, D)
    v = v_ref[0].astype(jnp.bfloat16)                                 # (tkv, D)

    for hd in range(n_heads):                 # static unroll over heads
        lo = hd * d_k
        q_h = q[:, lo:lo + d_k]               # (tq,  d_k)
        k_h = k[:, lo:lo + d_k]               # (tkv, d_k)
        v_h = v[:, lo:lo + d_k]

        # scores: contract last dims of q and k (no explicit k.T transpose).
        s = lax.dot_general(
            q_h, k_h, dimension_numbers=(((1,), (1,)), ((), ())),
            preferred_element_type=jnp.float32)                       # (tq, tkv)

        m_prev = m_ref[hd]                                            # (tq, 1)
        l_prev = l_ref[hd]
        m_new = jnp.maximum(m_prev, jnp.max(s, axis=-1, keepdims=True))
        alpha = jnp.exp(m_prev - m_new)
        p = jnp.exp(s - m_new)                                        # f32

        l_ref[hd] = alpha * l_prev + jnp.sum(p, axis=-1, keepdims=True)
        m_ref[hd] = m_new
        acc_ref[hd] = alpha * acc_ref[hd] + jnp.dot(
            p.astype(jnp.bfloat16), v_h, preferred_element_type=jnp.float32)

    @pl.when(ki == pl.num_programs(2) - 1)
    def _():
        for hd in range(n_heads):
            inv = pl.reciprocal(l_ref[hd], approx=True)               # EUP, (tq, 1)
            o_ref[0, :, hd * d_k:(hd + 1) * d_k] = (
                acc_ref[hd] * inv).astype(o_ref.dtype)


def pallas_attention(qkv, n_heads, out_dtype, tq=256, tkv=256):
    """qkv: (B, S, 3*D) packed [Q|K|V] -> (B, S, D) attention output."""
    B, S, three_d = qkv.shape
    D = three_d // 3
    d_k = D // n_heads
    # TODO(synk): d_model not a multiple of 128 needs an unpacked q/k/v path.
    assert D % 128 == 0, "packed QKV attention path requires d_model % 128 == 0"

    tq = _pick_tile(S, tq, 8)
    tkv = _pick_tile(S, tkv, 8)
    grid = (B, S // tq, S // tkv)
    scale = 1.0 / math.sqrt(d_k)

    kernel = functools.partial(_flash_attention_kernel,
                               n_heads=n_heads, d_k=d_k, scale=scale)

    cost = pl.CostEstimate(
        flops=4 * B * n_heads * S * S * d_k,
        transcendentals=B * n_heads * S * S,
        bytes_accessed=(3 * B * S * D * qkv.dtype.itemsize
                        + B * S * D * jnp.dtype(out_dtype).itemsize))

    return pl.pallas_call(
        kernel,
        out_shape=jax.ShapeDtypeStruct((B, S, D), out_dtype),
        grid_spec=pltpu.PrefetchScalarGridSpec(
            num_scalar_prefetch=0,
            grid=grid,
            in_specs=[
                # Same packed array passed three times; block index along the
                # last dim selects the Q (0), K (1) or V (2) column chunk.
                pl.BlockSpec((1, tq, D), lambda b, qi, ki: (b, qi, 0)),
                pl.BlockSpec((1, tkv, D), lambda b, qi, ki: (b, ki, 1)),
                pl.BlockSpec((1, tkv, D), lambda b, qi, ki: (b, ki, 2)),
            ],
            out_specs=pl.BlockSpec((1, tq, D), lambda b, qi, ki: (b, qi, 0)),
            scratch_shapes=[
                pltpu.VMEM((n_heads, tq, 1), jnp.float32),    # running max
                pltpu.VMEM((n_heads, tq, 1), jnp.float32),    # running sum
                pltpu.VMEM((n_heads, tq, d_k), jnp.float32),  # output accumulator
            ],
        ),
        compiler_params=pltpu.CompilerParams(
            dimension_semantics=("parallel", "parallel", "arbitrary"),
            vmem_limit_bytes=48 * 1024 * 1024),
        cost_estimate=cost,
    )(qkv, qkv, qkv)


# ---------------------------------------------------------------------------
# Module wrapper
# ---------------------------------------------------------------------------
def init_params(key, h, d_model):
    assert d_model % h == 0
    keys = jax.random.split(key, 8)
    scale = 1.0 / math.sqrt(d_model)

    def lin(kw, kb):
        w = jax.random.uniform(kw, (d_model, d_model), jnp.float32, -scale, scale)
        b = jax.random.uniform(kb, (d_model,), jnp.float32, -scale, scale)
        return w, b

    return {
        "q": lin(keys[0], keys[1]),
        "k": lin(keys[2], keys[3]),
        "v": lin(keys[4], keys[5]),
        "out": lin(keys[6], keys[7]),
    }


def multi_headed_attention(params, query, key, value, h, mask=None):
    """query/key/value: (B, S, d_model) -> (B, S, d_model)."""
    if mask is not None:
        # TODO(synk): attention mask (masked_fill) path not implemented.
        raise NotImplementedError("mask is not supported by this Pallas kernel")

    B, S, D = query.shape
    wq, bq = params["q"]
    wk, bk = params["k"]
    wv, bv = params["v"]

    if (query is key) and (key is value):
        # Self-attention (the BERT usage): fuse the three projections into one
        # tiled matmul — reads the activation from HBM once and triples the N
        # dimension for better MXU fill.
        w_qkv = jnp.concatenate([wq, wk, wv], axis=1).astype(jnp.bfloat16)  # (D, 3D)
        b_qkv = jnp.concatenate([bq, bk, bv], axis=0)                       # (3D,)
        qkv = pallas_linear(query.reshape(B * S, D), w_qkv, b_qkv,
                            out_dtype=jnp.bfloat16)
        qkv = qkv.reshape(B, S, 3 * D)
    else:
        # Cross-attention fallback: separate projections, packed afterwards.
        q_p = pallas_linear(query.reshape(B * S, D), wq.astype(jnp.bfloat16), bq,
                            out_dtype=jnp.bfloat16)
        k_p = pallas_linear(key.reshape(B * S, D), wk.astype(jnp.bfloat16), bk,
                            out_dtype=jnp.bfloat16)
        v_p = pallas_linear(value.reshape(B * S, D), wv.astype(jnp.bfloat16), bv,
                            out_dtype=jnp.bfloat16)
        qkv = jnp.concatenate([q_p, k_p, v_p], axis=-1).reshape(B, S, 3 * D)

    # Flash attention directly on the packed head-interleaved layout — no
    # (0,2,1,3) transposes anywhere.  Dropout inside attention = identity (eval).
    attn = pallas_attention(qkv, h, out_dtype=jnp.bfloat16)         # (B, S, D)

    w_o, b_o = params["out"]
    out = pallas_linear(attn.reshape(B * S, D), w_o.astype(jnp.bfloat16), b_o,
                        out_dtype=query.dtype)
    return out.reshape(B, S, D)


# ---------------------------------------------------------------------------
# Pure-JAX f32 reference (for sanity check)
# ---------------------------------------------------------------------------
def reference(params, query, key, value, h):
    B, S, D = query.shape
    d_k = D // h

    def project(p, x):
        w, b = p
        return (x @ w + b).reshape(B, S, h, d_k).transpose(0, 2, 1, 3)

    q = project(params["q"], query)
    k = project(params["k"], key)
    v = project(params["v"], value)
    scores = jnp.einsum("bhqd,bhkd->bhqk", q, k) / math.sqrt(d_k)
    p = jax.nn.softmax(scores, axis=-1)
    x = jnp.einsum("bhqk,bhkd->bhqd", p, v)
    x = x.transpose(0, 2, 1, 3).reshape(B, S, D)
    w_o, b_o = params["out"]
    return x @ w_o + b_o


if __name__ == "__main__":
    # Small shapes; d_model multiple of 128 so all blocks are lane-aligned.
    B, S, H, D_MODEL = 2, 8, 4, 128   # batch, seq, heads, d_model (d_k = 32)

    root = jax.random.PRNGKey(0)
    k_param, k_x = jax.random.split(root, 2)

    params = init_params(k_param, H, D_MODEL)
    x = jax.random.normal(k_x, (B, S, D_MODEL), jnp.float32)

    # BERT-style self-attention: query = key = value.
    out = multi_headed_attention(params, x, x, x, H)
    out = jax.block_until_ready(out)

    ref = reference(params, x, x, x, H)
    assert out.shape == (B, S, D_MODEL)
    max_err = float(jnp.max(jnp.abs(out - ref)))
    assert jnp.allclose(out, ref, atol=2e-2, rtol=2e-2), (
        f"mismatch vs reference (max abs err {max_err})")

    print("KERNEL_OK")
</pallas_src>

<mosaic_0001>
module attributes {stable_mosaic.version = 11 : i64} {
  func.func @_linear_kernel(%arg0: i32, %arg1: i32, %arg2: i32, %arg3: memref<16x128xf32, #tpu.memory_space<vmem>>, %arg4: memref<128x128xbf16, #tpu.memory_space<vmem>>, %arg5: memref<1x128xf32, #tpu.memory_space<vmem>>, %arg6: memref<16x128xbf16, #tpu.memory_space<vmem>>, %arg7: memref<16x128xf32, #tpu.memory_space<vmem>>) attributes {dimension_semantics = [#tpu.dimension_semantics<parallel>, #tpu.dimension_semantics<parallel>, #tpu.dimension_semantics<arbitrary>], iteration_bounds = array<i64: 1, 3, 1>, scalar_prefetch = 0 : i64, scratch_operands = 1 : i64, tpu.core_type = #tpu.core_type<tc>, window_params = [{transform_indices = @transform_0, window_bounds = array<i64: 16, 128>}, {transform_indices = @transform_1, window_bounds = array<i64: 128, 128>}, {transform_indices = @transform_2, window_bounds = array<i64: 1, 128>}, {transform_indices = @transform_3, window_bounds = array<i64: 16, 128>}]} {
    %c0_i32 = arith.constant 0 : i32
    %0 = arith.cmpi eq, %arg2, %c0_i32 : i32
    %1 = arith.extui %0 : i1 to i32
    %c0_i32_0 = arith.constant 0 : i32
    %2 = arith.cmpi ne, %1, %c0_i32_0 : i32
    scf.if %2 {
      %cst_10 = arith.constant 0.000000e+00 : f32
      %13 = vector.broadcast %cst_10 : f32 to vector<16x128xf32>
      %c0_11 = arith.constant 0 : index
      %c0_12 = arith.constant 0 : index
      %14 = vector.load %arg7[%c0_11, %c0_12] : memref<16x128xf32, #tpu.memory_space<vmem>>, vector<16x128xf32>
      tpu.vector_store %arg7[%c0_11, %c0_12], %13 {strides = array<i32>} : memref<16x128xf32, #tpu.memory_space<vmem>>, vector<16x128xf32>,
    } else {
    }
    %c0 = arith.constant 0 : index
    %c0_1 = arith.constant 0 : index
    %3 = vector.load %arg7[%c0, %c0_1] : memref<16x128xf32, #tpu.memory_space<vmem>>, vector<16x128xf32>
    %c0_2 = arith.constant 0 : index
    %c0_3 = arith.constant 0 : index
    %4 = vector.load %arg3[%c0_2, %c0_3] : memref<16x128xf32, #tpu.memory_space<vmem>>, vector<16x128xf32>
    %5 = arith.truncf %4 : vector<16x128xf32> to vector<16x128xbf16>
    %c0_4 = arith.constant 0 : index
    %c0_5 = arith.constant 0 : index
    %6 = vector.load %arg4[%c0_4, %c0_5] : memref<128x128xbf16, #tpu.memory_space<vmem>>, vector<128x128xbf16>
    %cst = arith.constant dense<0.000000e+00> : vector<16x128xf32>
    %7 = tpu.matmul %5, %6, %cst {dimension_numbers = #tpu.dot_dimension_numbers<[1], [0], [0], [1], [0, 0, 1, 1], [], []>} : vector<16x128xbf16>, vector<128x128xbf16>, vector<16x128xf32> -> vector<16x128xf32>
    %8 = arith.addf %3, %7 : vector<16x128xf32>
    %c0_6 = arith.constant 0 : index
    %c0_7 = arith.constant 0 : index
    %9 = vector.load %arg7[%c0_6, %c0_7] : memref<16x128xf32, #tpu.memory_space<vmem>>, vector<16x128xf32>
    tpu.vector_store %arg7[%c0_6, %c0_7], %8 {strides = array<i32>} : memref<16x128xf32, #tpu.memory_space<vmem>>, vector<16x128xf32>,
    %c0_i32_8 = arith.constant 0 : i32
    %10 = arith.cmpi eq, %arg2, %c0_i32_8 : i32
    %11 = arith.extui %10 : i1 to i32
    %c0_i32_9 = arith.constant 0 : i32
    %12 = arith.cmpi ne, %11, %c0_i32_9 : i32
    scf.if %12 {
      %c0_10 = arith.constant 0 : index
      %c0_11 = arith.constant 0 : index
      %13 = vector.load %arg7[%c0_10, %c0_11] : memref<16x128xf32, #tpu.memory_space<vmem>>, vector<16x128xf32>
      %c0_12 = arith.constant 0 : index
      %c0_13 = arith.constant 0 : index
      %14 = vector.load %arg5[%c0_12, %c0_13] : memref<1x128xf32, #tpu.memory_space<vmem>>, vector<1x128xf32>
      %15 = vector.broadcast %14 : vector<1x128xf32> to vector<16x128xf32>
      %16 = arith.addf %13, %15 : vector<16x128xf32>
      %17 = arith.truncf %16 : vector<16x128xf32> to vector<16x128xbf16>
      %c0_14 = arith.constant 0 : index
      %c0_15 = arith.constant 0 : index
      %18 = vector.load %arg6[%c0_14, %c0_15] : memref<16x128xbf16, #tpu.memory_space<vmem>>, vector<16x128xbf16>
      tpu.vector_store %arg6[%c0_14, %c0_15], %17 {strides = array<i32>} : memref<16x128xbf16, #tpu.memory_space<vmem>>, vector<16x128xbf16>,
    } else {
    }
    return
  }
  func.func @transform_0(%arg0: i32, %arg1: i32, %arg2: i32) -> (i32, i32) {
    %c0_i32 = arith.constant 0 : i32
    return %arg0, %arg2 : i32, i32
  }
  func.func @transform_1(%arg0: i32, %arg1: i32, %arg2: i32) -> (i32, i32) {
    %c0_i32 = arith.constant 0 : i32
    return %arg2, %arg1 : i32, i32
  }
  func.func @transform_2(%arg0: i32, %arg1: i32, %arg2: i32) -> (i32, i32) {
    %c0_i32 = arith.constant 0 : i32
    %c0_i32_0 = arith.constant 0 : i32
    return %c0_i32, %arg1 : i32, i32
  }
  func.func @transform_3(%arg0: i32, %arg1: i32, %arg2: i32) -> (i32, i32) {
    %c0_i32 = arith.constant 0 : i32
    return %arg0, %arg1 : i32, i32
  }
}

</mosaic_0001>

<bundles_post_ra>
// kernel: tpu_custom_call.1
= control target key start
LH: loop header
LB: loop body
LE: loop exit
PB: predicated region body
PF: predicated region fallthrough
CT: control target
= control target key end

     0   :  { %8 = vsyncpa [#allocation4], 0  ;;  %s1080_s0 = inlined_call_operand.hbm [shape: f32[16,128], index: 0, kind: input, shape index: {}]   ;;  %s1081_s1 = inlined_call_operand.hbm [shape: bf16[128,384], index: 1, kind: input, shape index: {}]   ;;  %s1082_s2 = inlined_call_operand.vmem [shape: f32[1,384], index: 2, kind: input, shape index: {}]   ;;  %s1083_s3 = inlined_call_operand.hbm [shape: bf16[16,384], index: 3, kind: output, shape index: {}]  }
   0x1   :  { %9 = vsyncpa [#allocation7], 0 }
   0x2   :  { %11 = vsyncpa [#allocation7 + $0x1], 0 }
   0x3   :  { %12 = vsyncpa [#allocation5], 0 }
   0x4   :  { %14 = vsyncpa [#allocation5 + $0x1], 0  ;;  %s863_s12 = smov 0   ;;  %s865_s13 = smov 0  }
   0x5   :  { %s867_s14 = smov 0   ;;  %s869_s15 = smov 0  }
   0x6   :  { %s871_s16 = smov 0   ;;  %s873_s17 = smov 0  }
   0x7 LB: > { %s531_s18 = sadd.s32 4294967295, %s828_s17   ;;  %s532_s19 = sadd.s32 4294967294, %s828_s17   ;;  %s828_s17 = sphi %s873_s17, %s20_s17   ;;  %s824_s16 = sphi %s871_s16, %s1108_s16   ;;  %s820_s15 = sphi %s869_s15, %s1107_s15   ;;  %s816_s14 = sphi %s867_s14, %s1106_s14   ;;  %s812_s13 = sphi %s865_s13, %s1105_s13   ;;  %s808_s12 = sphi %s863_s12, %s1104_s12  }
   0x8   : > { %p83_p0 = scmp.ne.s32.totalorder %s816_s14, %s812_s13  ;;  %p84_p1 = scmp.eq.s32.totalorder %s828_s17, 0 }
   0x9   : > { %p89_p2 = scmp.ne.s32.totalorder %s812_s13, %s808_s12  ;;  %p900_p3 = scmp.eq.s32.totalorder %s531_s18, 0 }
   0xa   : > { %p904_p4 = por %p84_p1, %p83_p0  ;;  %p141_p5 = scmp.eq.s32.totalorder %s531_s18, 2 }
   0xb   : > { %s1090_s20 = scalar_select %p900_p3, 1, 0 }
   0xc   : > { %p910_p6 = por %p900_p3, %p89_p2  ;;  %p147_p7 = scmp.eq.s32.totalorder %s532_s19, 2 }
   0xd   : > { %p914_p8 = por %p141_p5, %p83_p0  ;;  %p533_p9 = scmp.ge.s32.totalorder %s828_s17, 1 }
   0xe   : > { %s1092_s22 = scalar_select %p910_p6, 1, 0 }
   0xf   : > { %s1093_s23 = scalar_select %p914_p8, 1, 0 }
  0x10   : > { %p919_p10 = por %p147_p7, %p89_p2  ;;  %p154_p11 = scmp.lt.s32.totalorder %s828_s17, 4 }
  0x11   : > { %s830_s26 = smov [#allocation3]   ;;  %p614_p0 = scmp.lt.s32.totalorder %s828_s17, 3 }
  0x12   : > { %s1094_s24 = scalar_select %p919_p10, 1, 0 }
  0x13   : > { %p924_p12 = pnand %p533_p9, %p154_p11  ;;  %s170_s27 = sshll.u32 %s830_s26, 4  ;;  %s171_s27 = int_to_ptr.vmem [resolvable:$true] %s170_s27 }
  0x14   : > { %p939_p2 = pnand %p614_p0, %p904_p4  ;;  %s35_s30 = sadd.s32 1, %s824_s16 }
  0x15   : > { %s1095_s25 = scalar_select %p924_p12, 1, 0 }
  0x16   : > { %p601_p13 = pneg %p924_p12  ;;  %s684_s6 = scalar_lea.hbm %s1080_s0, 256 }
  0x17   : > { %s1097_s29 = scalar_select %p939_p2, 1, 0 }
  0x18   : > { %p933_p1 = pnand %p601_p13, %p900_p3  ;;  %p685_p5 = scmp.ne.s32.totalorder %s1080_s0, %s684_s6 }
  0x19   : > { %p691_p4 = scmp.lt.u32.totalorder %s684_s6, %s1080_s0 }
  0x1a   : > { %p686_p7 = pneg %p933_p1 }
  0x1c   : > { %p687_p9 = pnand %p686_p7, %p685_p5 }
  0x1e   : > { %p688_p11 = pneg %p687_p9 }
  0x20   : > { %p693_p13 = pnand %p691_p4, %p688_p11 }
  0x22   : > { %696 = shalt.err (!%p693_p13)
}
  0x23   : > { %s697_s11 = scalar_lea.vmem %s171_s27, 256  ;;  %p705_p6 = scmp.lt.s32.totalorder %s171_s27, %s171_s27 }
  0x24   : > { %p698_p0 = scmp.ne.s32.totalorder %s171_s27, %s697_s11  ;;  %p706_p3 = scmp.lt.s32.totalorder %s697_s11, %s697_s11 }
  0x26   : > { %p700_p10 = pnand %p698_p0, %p686_p7  ;;  %p707_p12 = por %p706_p3, %p705_p6 }
  0x28   : > { %p701_p8 = pneg %p700_p10 }
  0x2a   : > { %p708_p2 = pnand %p707_p12, %p701_p8 }
  0x2c   : > { %711 = shalt.err (!%p708_p2)
}
  0x2d   : > { %s831_s18 = smov 128   ;;  %s832_s19 = smov 8  }
  0x2e   : > { %604 = dma.hbm_to_vmem [thread:$0]  (!%p933_p1), %s1080_s0, 256, %s171_s27, [#allocation4], %s831_s18, %s831_s18, %s832_s19  }
  0x2f   : > { %p37_p5 = scmp.ge.s32.totalorder %s35_s30, 3  ;;  %s76_s4 = sadd.s32 1, %s816_s14 }
  0x30   : > { %s184_s5 = sand.u32 1, %s816_s14   ;;  %s537_s8 = sshll.u32 %s824_s16, 6 }
  0x31   : > { %s1110_s30 = smov (%p37_p5, %s35_s30), 0  ;;  %s536_s6 = sshll.u32 %s184_s5, 6 }
  0x32   : > { %s72_s7 = ssub.s32 %s824_s16, %s1110_s30  ;;  %s970_s28 = scalar_lea.hbm %s1081_s1, %s537_s8 }
  0x33   : > { %p74_p3 = scmp.eq.s32.totalorder %s72_s7, 0  ;;  %s188_s27 = scalar_lea.vmem [#allocation6], %s536_s6 }
  0x34   : > { %s197_s11 = sshll.u32 %s188_s27, 4  ;;  %s977_s19 = scalar_lea.sflag [#allocation7], %s184_s5  ;;  %s975_s11 = int_to_ptr.vmem [resolvable:$true] %s197_s11 }
  0x35   : > { %s973_s18 = scalar_select %p74_p3, %s816_s14, %s76_s4  }
  0x36   : > { %s712_s21 = scalar_lea.hbm %s970_s28, 1024  ;;  %p1098_p8 = scmp.ne.s32.totalorder %s1097_s29, 0 }
  0x37   : > { %p713_p6 = scmp.ne.s32.totalorder %s970_s28, %s712_s21  ;;  %s717_s8 = scalar_lea.hbm %s1081_s1, 3072 }
  0x38   : > { %p714_p10 = pneg %p1098_p8  ;;  %p718_p2 = scmp.lt.u32.totalorder %s970_s28, %s1081_s1 }
  0x39   : > { %p719_p7 = scmp.lt.u32.totalorder %s717_s8, %s712_s21  ;;  %p721_p11 = scmp.lt.u32.totalorder %s712_s21, %s970_s28 }
  0x3a   : > { %p715_p12 = pnand %p714_p10, %p713_p6 }
  0x3b   : > { %p720_p9 = por %p719_p7, %p718_p2 }
  0x3c   : > { %p716_p1 = pneg %p715_p12 }
  0x3d   : > { %p722_p4 = por %p721_p11, %p720_p9 }
  0x3f   : > { %p723_p13 = pnand %p722_p4, %p716_p1 }
  0x41   : > { %726 = shalt.err (!%p723_p13)
}
  0x42   : > { %s727_s4 = scalar_lea.vmem %s975_s11, 1024  ;;  %s833_s5 = smov [#allocation6]  }
  0x43   : > { %p728_p0 = scmp.ne.s32.totalorder %s975_s11, %s727_s4  ;;  %s732_s10 = sshll.u32 %s833_s5, 4  ;;  %s733_s10 = int_to_ptr.vmem [resolvable:$false] %s732_s10 }
  0x44   : > { %s734_s27 = scalar_lea.vmem %s733_s10, 2048  ;;  %p735_p6 = scmp.lt.s32.totalorder %s975_s11, %s733_s10 }
  0x45   : > { %p730_p5 = pnand %p728_p0, %p714_p10  ;;  %p736_p12 = scmp.lt.s32.totalorder %s734_s27, %s727_s4 }
  0x47   : > { %p731_p3 = pneg %p730_p5  ;;  %p737_p2 = por %p736_p12, %p735_p6 }
  0x49   : > { %p738_p7 = pnand %p737_p2, %p731_p3 }
  0x4b   : > { %741 = shalt.err (!%p738_p7)
}
  0x4c   : > { %s834_s21 = smov 192   ;;  %s835_s26 = smov 64  }
  0x4d   : > { %s836_s7 = smov 4   ;;  %p1099_p10 = scmp.ne.s32.totalorder %s1095_s25, 0 }
  0x4e   : > { %608 = dma.hbm_to_vmem [thread:$0]  (!%p1098_p8), %s970_s28, 1024, %s975_s11, %s977_s19, %s834_s21, %s835_s26, %s836_s7  }
  0x4f   : > { %215 = sbr.rel (%p1099_p10) target bundleno = 358 (0x166), region = 32  ;;  %p1100_p1 = scmp.ne.s32.totalorder (!%p1099_p10), %s1090_s20, 0 }
  0x56   : > { %795 = dma.done.wait (%p1100_p1), [#allocation4], 256  }
  0x57   : > { %797 = vsyncadd (%p1100_p1), [#allocation4], 4294967040  ;;  %s1012_s8 = sand.u32 1, %s812_s13   ;;  %p1101_p9 = scmp.ne.s32.totalorder %s1092_s22, 0 }
  0x58   : > { %s540_s6 = sshll.u32 %s1012_s8, 6  ;;  %s222_s9 = scalar_lea.sflag [#allocation7], %s1012_s8 }
  0x59   : > { %s225_s4 = scalar_lea.vmem [#allocation6], %s540_s6 }
  0x5a   : > { %799 = dma.done.wait (%p1101_p9), %s222_s9, 1024  }
  0x5b   : > { %801 = vsyncadd (%p1101_p9), %s222_s9, 4294966272  ;;  %v837_v0 = vmov 0.0   ;;  %vm838_vm0 = vmmov 0   ;;  %v676_v1 = vld [vmem:[%s225_s4] sm:$0xff]   ;;  %v677_v2 = vld [vmem:[%s225_s4 + $0x8] sm:$0xff]   ;;  %p253_p8 = scmp.lt.s32.totalorder %s820_s15, 2 }
  0x5c   : > { %573 = vmatprep.subr.bf16.mxu0 %v837_v0  ;;  %589 = vmatprep.mubr.msk.bf16.mxu0 %vm838_vm0, %v837_v0  ;;  %v678_v3 = vld [vmem:[%s225_s4 + $0x10] sm:$0xff]   ;;  %v679_v4 = vld [vmem:[%s225_s4 + $0x18] sm:$0xff]   ;;  %v680_v5 = vld [vmem:[%s225_s4 + $0x20] sm:$0xff]   ;;  %s541_s22 = sshll.u32 %s1012_s8, 3  ;;  %s554_s5 = sshll.u32 %s820_s15, 6 }
  0x5d   : > { %574 = vmatpush3.bf16.msra.mxu0 %v676_v1  ;;  %v681_v6 = vld [vmem:[%s225_s4 + $0x28] sm:$0xff]   ;;  %v682_v7 = vld [vmem:[%s225_s4 + $0x30] sm:$0xff]   ;;  %v683_v8 = vld [vmem:[%s225_s4 + $0x38] sm:$0xff]   ;;  %s254_s20 = scalar_select %p253_p8, %s820_s15, 2 }
  0x5e   : > { %575 = vmatprep.subr.bf16.mxu0 %v837_v0  ;;  %v266_v9 = vld [vmem:[#allocation3] sm:$0xff]  ;;  %v267_v10 = vld [vmem:[#allocation3 + $0x8] sm:$0xff]  ;;  %s250_s11 = scalar_lea.vmem [#allocation8], %s541_s22  ;;  %s1032_s21 = scalar_lea.hbm %s1083_s3, %s554_s5 }
  0x5f   : > { %v268_v11 = vpack.c.bf16 %v267_v10, %v266_v9  ;;  %s255_s28 = scalar_lea.vmem %s1082_s2, %s254_s20  ;;  %s418_s19 = sshll.u32 %s250_s11, 4  ;;  %s1027_s19 = int_to_ptr.vmem [resolvable:$true] %s418_s19 }
  0x60   : > { %v550_v13 = vld [vmem:[%s255_s28] ss:$0 sm:$0xff]  ;;  %s403_s26 = scalar_lea.sflag [#allocation5], %s1012_s8  ;;  %s742_s7 = scalar_lea.vmem %s1027_s19, 128 }
  0x61   : > { %576 = vmatpush3.bf16.msra.mxu0 %v677_v2  ;;  %p743_p11 = scmp.ne.s32.totalorder %s1027_s19, %s742_s7  ;;  %p1102_p4 = scmp.ne.s32.totalorder %s1093_s23, 0 }
  0x62   : > { %577 = vmatprep.subr.bf16.mxu0 %v837_v0  ;;  %s839_s15 = smov [#allocation8]  }
  0x63   : > { %p744_p13 = pnand %p743_p11, %p1102_p4  ;;  %s746_s6 = sshll.u32 %s839_s15, 4  ;;  %s747_s6 = int_to_ptr.vmem [resolvable:$false] %s746_s6 }
  0x64   : > { %s748_s9 = scalar_lea.vmem %s747_s6, 256  ;;  %p749_p5 = scmp.lt.s32.totalorder %s1027_s19, %s747_s6 }
  0x65   : > { %578 = vmatpush3.bf16.msra.mxu0 %v678_v3  ;;  %p745_p0 = pneg %p744_p13  ;;  %p750_p3 = scmp.lt.s32.totalorder %s748_s9, %s742_s7 }
  0x66   : > { %579 = vmatprep.subr.bf16.mxu0 %v837_v0 }
  0x67   : > { %p751_p6 = por %p750_p3, %p749_p5 }
  0x69   : > { %580 = vmatpush3.bf16.msra.mxu0 %v679_v4  ;;  %p752_p12 = pnand %p751_p6, %p745_p0 }
  0x6a   : > { %581 = vmatprep.subr.bf16.mxu0 %v837_v0 }
  0x6d   : > { %582 = vmatpush3.bf16.msra.mxu0 %v680_v5 }
  0x6e   : > { %583 = vmatprep.subr.bf16.mxu0 %v837_v0 }
  0x71   : > { %584 = vmatpush3.bf16.msra.mxu0 %v681_v6 }
  0x72   : > { %585 = vmatprep.subr.bf16.mxu0 %v837_v0 }
  0x75   : > { %586 = vmatpush3.bf16.msra.mxu0 %v682_v7 }
  0x76   : > { %587 = vmatprep.subr.bf16.mxu0 %v837_v0 }
  0x79   : > { %588 = vmatpush3.bf16.msra.mxu0 %v683_v8 }
  0x7c   : > { %590 = vmatmul.mubr.bf16.vlgmr.msra.gmra.mrb[0].mxu0 %v268_v11 }
 0x14f   : > { %v367_v12 = vpop.f32.mrb[0].mxu0 }
 0x150   : > { %v591_v14 = vpop.f32.mrb[1].mxu0  ;;  %v390_v16 = vadd.f32 %v550_v13, %v367_v12 }
 0x151   : > { %v370_v15 = vpop.f32.mrb[2].mxu0 }
 0x152   : > { %v391_v17 = vadd.f32 %v550_v13, %v370_v15  ;;  %v592_v18 = vpop.f32.mrb[3].mxu0 }
 0x154   : > { %v562_v19 = vpack.c.bf16 %v391_v17, %v390_v16 }
 0x156   : > { %563 = vst [vmem:[%s250_s11] sm:$0xff] %v562_v19  }
 0x157   : > { %755 = shalt.err (!%p752_p12)
}
 0x158   : > { %s756_s4 = scalar_lea.hbm %s1032_s21, 128  ;;  %s760_s25 = scalar_lea.hbm %s1083_s3, 384 }
 0x159   : > { %p757_p2 = scmp.ne.s32.totalorder %s1032_s21, %s756_s4  ;;  %p761_p1 = scmp.lt.u32.totalorder %s1032_s21, %s1083_s3 }
 0x15a   : > { %p762_p9 = scmp.lt.u32.totalorder %s760_s25, %s756_s4  ;;  %p764_p11 = scmp.lt.u32.totalorder %s756_s4, %s1032_s21 }
 0x15b   : > { %p758_p7 = pnand %p757_p2, %p1102_p4 }
 0x15c   : > { %p763_p8 = por %p762_p9, %p761_p1 }
 0x15d   : > { %p759_p10 = pneg %p758_p7 }
 0x15e   : > { %p765_p13 = por %p764_p11, %p763_p8 }
 0x160   : > { %p766_p0 = pnand %p765_p13, %p759_p10 }
 0x162   : > { %769 = shalt.err (!%p766_p0)
}
 0x163   : > { %s840_s11 = smov 64   ;;  %s841_s5 = smov 192  }
 0x164   : > { %s842_s10 = smov 4  }
 0x165   : > { %599 = dma.vmem_to_hbm [thread:$0]  (%p1102_p4), %s1027_s19, 128, %s1032_s21, %s403_s26, %s840_s11, %s841_s5, %s842_s10  }
 0x166 PF: > { %p616_p5 = scmp.ge.s32.totalorder %s828_s17, 2  ;;  %s433_s27 = sand.u32 1, %s808_s12  }
 0x167   : > { %p1103_p3 = scmp.ne.s32.totalorder %s1094_s24, 0  ;;  %s434_s7 = scalar_lea.sflag [#allocation5], %s433_s27 }
 0x169   : > { %p610_p6 = pnand %p616_p5, %p1103_p3 }
 0x16b   : > { %803 = dma.done.wait (!%p610_p6), %s434_s7, 128  }
 0x16c   : > { %805 = vsyncadd (!%p610_p6), %s434_s7, 4294967168  ;;  %s20_s17 = sadd.s32 1, %s828_s17   ;;  %s1104_s12 = smov %s812_s13 }
 0x16d   : > { %p17_p12 = scmp.ge.s32.totalorder %s20_s17, 5   ;;  %s1105_s13 = smov %s816_s14 }
 0x16e   : > { %s1106_s14 = smov %s973_s18  ;;  %s1107_s15 = smov %s824_s16 }
 0x16f   : > { %s1108_s16 = smov %s1110_s30  ;;  %19 = sbr.rel (!%p17_p12) target bundleno = 7 (0x7), region = 94 }
 0x176   :  { %439 = vsyncpa [#allocation4], 1 }
 0x177   :  { %441 = vsyncpa [#allocation4 + $0x1], 1 }
 0x178   :  { %442 = vsyncpa [#allocation7], 1 }
 0x179   :  { %444 = vsyncpa [#allocation7 + $0x1], 1 }
 0x17a   :  { %445 = vsyncpa [#allocation5], 1 }
 0x17b   :  { %447 = vsyncpa [#allocation5 + $0x1], 1 }

</bundles_post_ra>
